<compile_context>
chip_gen: v7x
topology: tpu7x:2x2x1
jax: 0.10.0
libtpu: 0.0.40
codegen_flags: <defaults>
</compile_context>

<pallas_src>
import functools

import jax
import jax.numpy as jnp
from jax.experimental import pallas as pl
from jax.experimental.pallas import tpu as pltpu


def _round_up(x, m):
    return ((x + m - 1) // m) * m


def convblock_kernel(p_ref, w_ref, shift_ref, alpha_ref, o_ref):
    # p_ref:     (TM, K)   bf16 im2col patch tile
    # w_ref:     (K, TN)   bf16 conv weight tile with BN scale folded in
    # shift_ref: (1, TN)   f32  (conv_bias - running_mean) * scale + beta
    # alpha_ref: (1,)      f32  PReLU slope, in SMEM
    acc = jnp.dot(p_ref[...], w_ref[...], preferred_element_type=jnp.float32)
    y = acc + shift_ref[...]                      # folded conv-bias + BN shift
    alpha = alpha_ref[0]
    o_ref[...] = jnp.where(y >= 0.0, y, alpha * y).astype(o_ref.dtype)


@functools.partial(jax.jit, static_argnames=("stride", "padding", "eps"))
def conv_block_forward(x, weight, bias, gamma, beta, running_mean, running_var,
                       prelu_alpha, *, stride=1, padding=0, eps=1e-5):
    """ConvBlock forward: Conv2d + BatchNorm2d(eval) + PReLU.  x is NCHW."""
    N, C, H, W = x.shape
    OC, _, KH, KW = weight.shape
    OH = (H + 2 * padding - KH) // stride + 1
    OW = (W + 2 * padding - KW) // stride + 1
    K = C * KH * KW
    M = N * OH * OW
    LANES = 128
    OCp = _round_up(OC, LANES)

    # ---- glue: NHWC im2col (last-axis concat; no big transpose) ----
    x_nhwc = jnp.transpose(x, (0, 2, 3, 1)).astype(jnp.bfloat16)     # (N,H,W,C)
    xp = jnp.pad(x_nhwc, ((0, 0), (padding, padding), (padding, padding), (0, 0)))
    cols = []
    for kh in range(KH):
        for kw in range(KW):
            cols.append(xp[:, kh:kh + stride * OH:stride,
                            kw:kw + stride * OW:stride, :])          # (N,OH,OW,C)
    # K ordered as (kh, kw, c); trailing-axis concat, then trivial collapse.
    patches = jnp.concatenate(cols, axis=-1).reshape(M, K)

    # ---- fold BN (running stats) and conv bias into weight / shift ----
    scale = gamma / jnp.sqrt(running_var + eps)                       # (OC,)
    w2 = jnp.transpose(weight, (2, 3, 1, 0)).reshape(K, OC)           # (KH,KW,C)->K
    w2 = (w2 * scale[None, :]).astype(jnp.bfloat16)
    w2 = jnp.pad(w2, ((0, 0), (0, OCp - OC)))                         # lane-dense
    shift = (bias - running_mean) * scale + beta                      # (OC,)
    shift = jnp.pad(shift, (0, OCp - OC)).reshape(1, OCp).astype(jnp.float32)
    alpha = jnp.asarray(prelu_alpha, jnp.float32).reshape(1)

    # ---- OC tile (always a 128-multiple that evenly divides OCp) ----
    if OCp <= 512:
        tn = OCp
    elif OCp % 512 == 0:
        tn = 512
    elif OCp % 256 == 0:
        tn = 256
    else:
        tn = 128

    # ---- M tile / VMEM budget (double-buffered in/out, safe on v5e/v6e/v7x) ----
    budget = 20 * 1024 * 1024
    tm = 1024
    while tm > 16 and (2 * tm * K * 2 + 2 * K * tn * 2 + 2 * tm * tn * 4) > budget:
        tm //= 2
    tm = min(tm, _round_up(M, 16))
    Mp = _round_up(M, tm)
    if Mp != M:
        patches = jnp.pad(patches, ((0, Mp - M), (0, 0)))
    vmem_bytes = 2 * tm * K * 2 + 2 * K * tn * 2 + 2 * tm * tn * 4 + 2 * tn * 4
    vmem_limit = int(min(48 * 1024 * 1024, max(32 * 1024 * 1024, 2 * vmem_bytes)))

    cost = pl.CostEstimate(
        flops=2 * Mp * K * OCp,
        transcendentals=0,
        bytes_accessed=Mp * K * 2 + K * OCp * 2 * (Mp // tm) + Mp * OCp * 4,
    )

    out = pl.pallas_call(
        convblock_kernel,
        out_shape=jax.ShapeDtypeStruct((Mp, OCp), jnp.float32),
        grid_spec=pltpu.PrefetchScalarGridSpec(
            num_scalar_prefetch=0,
            # M outer, OC inner: big patch tile stays resident across the OC loop.
            grid=(Mp // tm, OCp // tn),
            in_specs=[
                pl.BlockSpec((tm, K), lambda i, j: (i, 0)),
                pl.BlockSpec((K, tn), lambda i, j: (0, j)),
                pl.BlockSpec((1, tn), lambda i, j: (0, j)),
                pl.BlockSpec(memory_space=pltpu.MemorySpace.SMEM),
            ],
            out_specs=pl.BlockSpec((tm, tn), lambda i, j: (i, j)),
        ),
        compiler_params=pltpu.CompilerParams(
            dimension_semantics=("parallel", "parallel"),
            vmem_limit_bytes=vmem_limit,
        ),
        cost_estimate=cost,
    )(patches, w2, shift, alpha)

    out = out[:M, :OC].reshape(N, OH, OW, OC).transpose(0, 3, 1, 2)   # -> NCHW
    return out


if __name__ == "__main__":
    key = jax.random.PRNGKey(0)
    k1, k2, k3, k4, k5, k6, k7 = jax.random.split(key, 7)

    # ConvBlock(dim=2, in_channels=4, out_channels=8, kernel_size=3,
    #           stride=1, padding=1, bias=True)
    N, C, H, W = 2, 4, 16, 16
    OC, KH, KW = 8, 3, 3
    stride, padding, eps = 1, 1, 1e-5

    x = jax.random.normal(k1, (N, C, H, W), jnp.float32)
    weight = jax.random.normal(k2, (OC, C, KH, KW), jnp.float32) * 0.1
    bias = jax.random.normal(k3, (OC,), jnp.float32) * 0.1
    gamma = 1.0 + 0.1 * jax.random.normal(k4, (OC,), jnp.float32)
    beta = 0.1 * jax.random.normal(k5, (OC,), jnp.float32)
    running_mean = 0.1 * jax.random.normal(k6, (OC,), jnp.float32)
    running_var = 0.5 + jnp.abs(jax.random.normal(k7, (OC,), jnp.float32))
    prelu_alpha = jnp.float32(0.25)   # nn.PReLU() default init

    out = conv_block_forward(x, weight, bias, gamma, beta, running_mean,
                             running_var, prelu_alpha,
                             stride=stride, padding=padding, eps=eps)
    out = jax.block_until_ready(out)

    # pure-JAX f32 reference for sanity (kernel uses bf16 operands, f32 accum)
    ref = jax.lax.conv_general_dilated(
        x, weight, (stride, stride), [(padding, padding)] * 2,
        dimension_numbers=("NCHW", "OIHW", "NCHW"))
    ref = ref + bias.reshape(1, OC, 1, 1)
    ref = (ref - running_mean.reshape(1, OC, 1, 1)) / jnp.sqrt(
        running_var.reshape(1, OC, 1, 1) + eps)
    ref = ref * gamma.reshape(1, OC, 1, 1) + beta.reshape(1, OC, 1, 1)
    ref = jnp.where(ref >= 0, ref, prelu_alpha * ref)

    assert out.shape == (N, OC, H, W), out.shape
    err = float(jnp.max(jnp.abs(out - ref)))
    assert jnp.allclose(out, ref, atol=5e-2, rtol=5e-2), err
    print("KERNEL_OK")
</pallas_src>

<mosaic_0001>
module attributes {stable_mosaic.version = 11 : i64} {
  func.func @convblock_kernel(%arg0: i32, %arg1: i32, %arg2: memref<512x36xbf16, #tpu.memory_space<vmem>>, %arg3: memref<36x128xbf16, #tpu.memory_space<vmem>>, %arg4: memref<1x128xf32, #tpu.memory_space<vmem>>, %arg5: memref<1xf32, #tpu.memory_space<smem>>, %arg6: memref<512x128xf32, #tpu.memory_space<vmem>>) attributes {dimension_semantics = [#tpu.dimension_semantics<parallel>, #tpu.dimension_semantics<parallel>], iteration_bounds = array<i64: 1, 1>, scalar_prefetch = 0 : i64, scratch_operands = 0 : i64, tpu.core_type = #tpu.core_type<tc>, window_params = [{transform_indices = @transform_0, window_bounds = array<i64: 512, 36>}, {transform_indices = @transform_1, window_bounds = array<i64: 36, 128>}, {transform_indices = @transform_2, window_bounds = array<i64: 1, 128>}, {transform_indices = @transform_3, window_bounds = array<i64: 1>}, {transform_indices = @transform_4, window_bounds = array<i64: 512, 128>}]} {
    %c0 = arith.constant 0 : index
    %c0_0 = arith.constant 0 : index
    %0 = vector.load %arg2[%c0, %c0_0] : memref<512x36xbf16, #tpu.memory_space<vmem>>, vector<512x36xbf16>
    %c0_1 = arith.constant 0 : index
    %c0_2 = arith.constant 0 : index
    %1 = vector.load %arg3[%c0_1, %c0_2] : memref<36x128xbf16, #tpu.memory_space<vmem>>, vector<36x128xbf16>
    %cst = arith.constant dense<0.000000e+00> : vector<512x128xf32>
    %2 = tpu.matmul %0, %1, %cst {dimension_numbers = #tpu.dot_dimension_numbers<[1], [0], [0], [1], [0, 0, 1, 1], [], []>} : vector<512x36xbf16>, vector<36x128xbf16>, vector<512x128xf32> -> vector<512x128xf32>
    %c0_3 = arith.constant 0 : index
    %c0_4 = arith.constant 0 : index
    %3 = vector.load %arg4[%c0_3, %c0_4] : memref<1x128xf32, #tpu.memory_space<vmem>>, vector<1x128xf32>
    %4 = vector.broadcast %3 : vector<1x128xf32> to vector<512x128xf32>
    %5 = arith.addf %2, %4 : vector<512x128xf32>
    %c0_5 = arith.constant 0 : index
    %6 = memref.load %arg5[%c0_5] : memref<1xf32, #tpu.memory_space<smem>>
    %cst_6 = arith.constant 0.000000e+00 : f32
    %7 = vector.broadcast %cst_6 : f32 to vector<512x128xf32>
    %8 = arith.cmpf oge, %5, %7 : vector<512x128xf32>
    %9 = vector.broadcast %6 : f32 to vector<512x128xf32>
    %10 = arith.mulf %9, %5 : vector<512x128xf32>
    %11 = arith.select %8, %5, %10 : vector<512x128xi1>, vector<512x128xf32>
    %c0_7 = arith.constant 0 : index
    %c0_8 = arith.constant 0 : index
    %12 = vector.load %arg6[%c0_7, %c0_8] : memref<512x128xf32, #tpu.memory_space<vmem>>, vector<512x128xf32>
    tpu.vector_store %arg6[%c0_7, %c0_8], %11 {strides = array<i32>} : memref<512x128xf32, #tpu.memory_space<vmem>>, vector<512x128xf32>,
    return
  }
  func.func @transform_0(%arg0: i32, %arg1: i32) -> (i32, i32) {
    %c0_i32 = arith.constant 0 : i32
    %c0_i32_0 = arith.constant 0 : i32
    return %arg0, %c0_i32 : i32, i32
  }
  func.func @transform_1(%arg0: i32, %arg1: i32) -> (i32, i32) {
    %c0_i32 = arith.constant 0 : i32
    %c0_i32_0 = arith.constant 0 : i32
    return %c0_i32, %arg1 : i32, i32
  }
  func.func @transform_2(%arg0: i32, %arg1: i32) -> (i32, i32) {
    %c0_i32 = arith.constant 0 : i32
    %c0_i32_0 = arith.constant 0 : i32
    return %c0_i32, %arg1 : i32, i32
  }
  func.func @transform_3(%arg0: i32, %arg1: i32) -> i32 {
    %c0_i32 = arith.constant 0 : i32
    %c0_i32_0 = arith.constant 0 : i32
    return %c0_i32 : i32
  }
  func.func @transform_4(%arg0: i32, %arg1: i32) -> (i32, i32) {
    %c0_i32 = arith.constant 0 : i32
    return %arg0, %arg1 : i32, i32
  }
}

</mosaic_0001>

<bundles_post_ra>
// kernel: conv_block_forward.1
= control target key start
LH: loop header
LB: loop body
LE: loop exit
PB: predicated region body
PF: predicated region fallthrough
CT: control target
= control target key end

     0   :  { %vm270_vm0 = vcmask 293888   ;;  %vm367_vm1 = vcmask 1041408   ;;  %s1630_s1 = inlined_call_operand.vmem [shape: bf16[36,128], index: 1, kind: input, shape index: {}]   ;;  %s1631_s0 = inlined_call_operand.vmem [shape: bf16[512,36], index: 0, kind: input, shape index: {}]   ;;  %s1632_s2 = inlined_call_operand.vmem [shape: f32[1,128], index: 2, kind: input, shape index: {}]   ;;  %s1633_s3 = inlined_call_operand.<no memory space> [shape: f32[1], index: 3, kind: input, shape index: {}]   ;;  %s1634_s4 = inlined_call_operand.vmem [shape: f32[512,128], index: 4, kind: output, shape index: {}]  }
   0x1   :  { %v1103_v0 = vld [vmem:[%s1630_s1] sm:$0xff]   ;;  %v1104_v1 = vld [vmem:[%s1630_s1 + $0x8] sm:$0xff]   ;;  %v1105_v2 = vld [vmem:[%s1630_s1 + $0x10] ss:$0 sps:$4 sm:$0x33]   ;;  %v1308_v38 = vstv %s1633_s3 }
   0x2   :  { %1025 = vmatprep.subr.bf16.mxu0 %v1103_v0  ;;  %1095 = vmatprep.subr.bf16.mxu1 %v1103_v0  ;;  %v1106_v3 = vld [vmem:[%s1631_s0] sm:$0xff]   ;;  %v369_v5 = vsel %vm367_vm1, %v1105_v2, 0  ;;  %v1108_v6 = vld [vmem:[%s1631_s0 + $0x8] sm:$0xff]   ;;  %v1110_v8 = vld [vmem:[%s1631_s0 + $0x10] sm:$0xff]  }
   0x3   :  { %1026 = vmatpush3.bf16.msra.mxu0 %v1103_v0  ;;  %1098 = vmatpush3.bf16.msra.mxu1 %v1103_v0  ;;  %v1107_v4 = vld [vmem:[%s1631_s0 + $0x80] sm:$0xff]   ;;  %v1109_v7 = vld [vmem:[%s1631_s0 + $0x88] sm:$0xff]   ;;  %v1111_v9 = vld [vmem:[%s1631_s0 + $0x90] sm:$0xff]  }
   0x4   :  { %1027 = vmatprep.subr.bf16.mxu0 %v1104_v1  ;;  %1096 = vmatprep.subr.bf16.mxu1 %v1104_v1  ;;  %v1112_v10 = vld [vmem:[%s1631_s0 + $0x18] sm:$0xff]   ;;  %v1114_v12 = vld [vmem:[%s1631_s0 + $0x20] sm:$0xff]   ;;  %v1116_v14 = vld [vmem:[%s1631_s0 + $0x28] sm:$0xff]  }
   0x5   :  { %1031 = vmatprep.mubr.msk.bf16.mxu0 %vm270_vm0, %v1106_v3  ;;  %1063 = vmatprep.mubr.msk.bf16.mxu1 %vm270_vm0, %v1107_v4  ;;  %v1113_v11 = vld [vmem:[%s1631_s0 + $0x98] sm:$0xff]   ;;  %v1115_v13 = vld [vmem:[%s1631_s0 + $0xa0] sm:$0xff]   ;;  %v1117_v15 = vld [vmem:[%s1631_s0 + $0xa8] sm:$0xff]  }
   0x6   :  { %v1118_v16 = vld [vmem:[%s1631_s0 + $0x30] sm:$0xff]   ;;  %v1120_v18 = vld [vmem:[%s1631_s0 + $0x38] sm:$0xff]   ;;  %v1122_v20 = vld [vmem:[%s1631_s0 + $0x40] sm:$0xff]  }
   0x7   :  { %1028 = vmatpush3.bf16.msra.mxu0 %v1104_v1  ;;  %1099 = vmatpush3.bf16.msra.mxu1 %v1104_v1  ;;  %v1119_v17 = vld [vmem:[%s1631_s0 + $0xb0] sm:$0xff]   ;;  %v1121_v19 = vld [vmem:[%s1631_s0 + $0xb8] sm:$0xff]   ;;  %v1123_v21 = vld [vmem:[%s1631_s0 + $0xc0] sm:$0xff]  }
   0x8   :  { %1101 = vmatprep.subr.msk.bf16.mxu0 %vm367_vm1, %v1105_v2  ;;  %1102 = vmatprep.subr.msk.bf16.mxu1 %vm367_vm1, %v1105_v2  ;;  %v1124_v22 = vld [vmem:[%s1631_s0 + $0x48] sm:$0xff]   ;;  %v1126_v24 = vld [vmem:[%s1631_s0 + $0x50] sm:$0xff]   ;;  %v1128_v26 = vld [vmem:[%s1631_s0 + $0x58] sm:$0xff]  }
   0x9   :  { %v1125_v23 = vld [vmem:[%s1631_s0 + $0xc8] sm:$0xff]   ;;  %v1127_v25 = vld [vmem:[%s1631_s0 + $0xd0] sm:$0xff]   ;;  %v1129_v27 = vld [vmem:[%s1631_s0 + $0xd8] sm:$0xff]  }
   0xa   :  { %v1130_v28 = vld [vmem:[%s1631_s0 + $0x60] sm:$0xff]   ;;  %v1132_v30 = vld [vmem:[%s1631_s0 + $0x68] sm:$0xff]   ;;  %v1134_v32 = vld [vmem:[%s1631_s0 + $0x70] sm:$0xff]  }
   0xb   :  { %1030 = vmatpush3.bf16.msra.mxu0 %v369_v5  ;;  %1100 = vmatpush3.bf16.msra.mxu1 %v369_v5  ;;  %v1131_v29 = vld [vmem:[%s1631_s0 + $0xe0] sm:$0xff]   ;;  %v1133_v31 = vld [vmem:[%s1631_s0 + $0xe8] sm:$0xff]   ;;  %v1135_v33 = vld [vmem:[%s1631_s0 + $0xf0] sm:$0xff]  }
   0xc   :  { %v1136_v34 = vld [vmem:[%s1631_s0 + $0x78] sm:$0xff]   ;;  %v1303_v36 = vld [vmem:[%s1632_s2] ss:$0 sm:$0xff] }
   0xd   :  { %v1137_v35 = vld [vmem:[%s1631_s0 + $0xf8] sm:$0xff]  }
   0xe   :  { %1032 = vmatmul.mubr.msk.bf16.vlgmr.msra.gmra.mrb[0].mxu0 %vm270_vm0, %v1108_v6  ;;  %1064 = vmatmul.mubr.msk.bf16.vlgmr.msra.gmra.mrb[0].mxu1 %vm270_vm0, %v1109_v7 }
   0xf   :  { %1035 = vmatprep.mubr.msk.bf16.mxu0 %vm270_vm0, %v1110_v8  ;;  %1067 = vmatprep.mubr.msk.bf16.mxu1 %vm270_vm0, %v1111_v9 }
  0x16   :  { %1036 = vmatmul.mubr.msk.bf16.gmra.mrb[4].mxu0 %vm270_vm0, %v1112_v10  ;;  %1068 = vmatmul.mubr.msk.bf16.gmra.mrb[4].mxu1 %vm270_vm0, %v1113_v11 }
  0x17   :  { %1039 = vmatprep.mubr.msk.bf16.mxu0 %vm270_vm0, %v1114_v12  ;;  %1071 = vmatprep.mubr.msk.bf16.mxu1 %vm270_vm0, %v1115_v13 }
  0x1e   :  { %1040 = vmatmul.mubr.msk.bf16.gmra.mrb[8].mxu0 %vm270_vm0, %v1116_v14  ;;  %1072 = vmatmul.mubr.msk.bf16.gmra.mrb[8].mxu1 %vm270_vm0, %v1117_v15 }
  0x1f   :  { %1043 = vmatprep.mubr.msk.bf16.mxu0 %vm270_vm0, %v1118_v16  ;;  %1075 = vmatprep.mubr.msk.bf16.mxu1 %vm270_vm0, %v1119_v17 }
  0x26   :  { %1044 = vmatmul.mubr.msk.bf16.gmra.mrb[12].mxu0 %vm270_vm0, %v1120_v18  ;;  %1076 = vmatmul.mubr.msk.bf16.gmra.mrb[12].mxu1 %vm270_vm0, %v1121_v19 }
  0x27   :  { %1047 = vmatprep.mubr.msk.bf16.mxu0 %vm270_vm0, %v1122_v20  ;;  %1079 = vmatprep.mubr.msk.bf16.mxu1 %vm270_vm0, %v1123_v21 }
  0x2e   :  { %1048 = vmatmul.mubr.msk.bf16.gmra.mrb[16].mxu0 %vm270_vm0, %v1124_v22  ;;  %1080 = vmatmul.mubr.msk.bf16.gmra.mrb[16].mxu1 %vm270_vm0, %v1125_v23 }
  0x2f   :  { %1051 = vmatprep.mubr.msk.bf16.mxu0 %vm270_vm0, %v1126_v24  ;;  %1083 = vmatprep.mubr.msk.bf16.mxu1 %vm270_vm0, %v1127_v25 }
  0x36   :  { %1052 = vmatmul.mubr.msk.bf16.gmra.mrb[20].mxu0 %vm270_vm0, %v1128_v26  ;;  %1084 = vmatmul.mubr.msk.bf16.gmra.mrb[20].mxu1 %vm270_vm0, %v1129_v27 }
  0x37   :  { %1055 = vmatprep.mubr.msk.bf16.mxu0 %vm270_vm0, %v1130_v28  ;;  %1087 = vmatprep.mubr.msk.bf16.mxu1 %vm270_vm0, %v1131_v29 }
  0x3e   :  { %1056 = vmatmul.mubr.msk.bf16.gmra.mrb[24].mxu0 %vm270_vm0, %v1132_v30  ;;  %1088 = vmatmul.mubr.msk.bf16.gmra.mrb[24].mxu1 %vm270_vm0, %v1133_v31 }
  0x3f   :  { %1059 = vmatprep.mubr.msk.bf16.mxu0 %vm270_vm0, %v1134_v32  ;;  %1091 = vmatprep.mubr.msk.bf16.mxu1 %vm270_vm0, %v1135_v33 }
  0x46   :  { %1060 = vmatmul.mubr.msk.bf16.gmra.mrb[28].mxu0 %vm270_vm0, %v1136_v34  ;;  %1092 = vmatmul.mubr.msk.bf16.gmra.mrb[28].mxu1 %vm270_vm0, %v1137_v35 }
  0xe1   :  { %v1033_v37 = vpop.f32.mrb[0].mxu0  ;;  %v1065_v39 = vpop.f32.mrb[0].mxu1 }
  0xe2   :  { %v414_v40 = vadd.f32 %v1033_v37, %v1303_v36  ;;  %v542_v41 = vadd.f32 %v1065_v39, %v1303_v36  ;;  %v405_v42 = vpop.f32.mrb[1].mxu0  ;;  %v533_v43 = vpop.f32.mrb[1].mxu1 }
  0xe3   :  { %v406_v44 = vadd.f32 %v1303_v36, %v405_v42  ;;  %v534_v45 = vadd.f32 %v1303_v36, %v533_v43  ;;  %v1034_v46 = vpop.f32.mrb[2].mxu0  ;;  %v1066_v47 = vpop.f32.mrb[2].mxu1 }
  0xe4   :  { %vm663_vm2 = vcmp.ge.f32.partialorder %v414_v40, 0.0  ;;  %v728_v48 = vmul.f32 %v1308_v38, %v414_v40  ;;  %vm695_vm3 = vcmp.ge.f32.partialorder %v542_v41, 0.0  ;;  %v760_v49 = vmul.f32 %v1308_v38, %v542_v41  ;;  %v408_v50 = vpop.f32.mrb[3].mxu0  ;;  %v536_v51 = vpop.f32.mrb[3].mxu1 }
  0xe5   :  { %vm661_vm4 = vcmp.ge.f32.partialorder %v406_v44, 0.0  ;;  %v726_v52 = vmul.f32 %v1308_v38, %v406_v44  ;;  %vm693_vm5 = vcmp.ge.f32.partialorder %v534_v45, 0.0  ;;  %v758_v53 = vmul.f32 %v1308_v38, %v534_v45 }
  0xe6   :  { %v792_v54 = vsel %vm663_vm2, %v414_v40, %v728_v48  ;;  %v824_v55 = vsel %vm695_vm3, %v542_v41, %v760_v49  ;;  %v417_v56 = vadd.f32 %v1034_v46, %v1303_v36  ;;  %v545_v57 = vadd.f32 %v1066_v47, %v1303_v36 }
  0xe7   :  { %856 = vst [vmem:[%s1634_s4 + $0x10] sm:$0xff] %v792_v54  ;;  %888 = vst [vmem:[%s1634_s4 + $0x110] sm:$0xff] %v824_v55  ;;  %v790_v58 = vsel %vm661_vm4, %v406_v44, %v726_v52  ;;  %v822_v59 = vsel %vm693_vm5, %v534_v45, %v758_v53  ;;  %v409_v60 = vadd.f32 %v1303_v36, %v408_v50 }
  0xe8   :  { %v537_v61 = vadd.f32 %v1303_v36, %v536_v51  ;;  %854 = vst [vmem:[%s1634_s4] sm:$0xff] %v790_v58  ;;  %886 = vst [vmem:[%s1634_s4 + $0x100] sm:$0xff] %v822_v59  ;;  %vm664_vm6 = vcmp.ge.f32.partialorder %v417_v56, 0.0  ;;  %v729_v62 = vmul.f32 %v1308_v38, %v417_v56  ;;  %vm696_vm7 = vcmp.ge.f32.partialorder %v545_v57, 0.0 }
  0xe9   :  { %v761_v63 = vmul.f32 %v1308_v38, %v545_v57  ;;  %vm662_vm8 = vcmp.ge.f32.partialorder %v409_v60, 0.0  ;;  %v727_v0 = vmul.f32 %v1308_v38, %v409_v60  ;;  %v1037_v2 = vpop.f32.mrb[4].mxu0  ;;  %v1069_v3 = vpop.f32.mrb[4].mxu1 }
  0xea   :  { %vm694_vm9 = vcmp.ge.f32.partialorder %v537_v61, 0.0  ;;  %v759_v1 = vmul.f32 %v1308_v38, %v537_v61  ;;  %v793_v4 = vsel %vm664_vm6, %v417_v56, %v729_v62  ;;  %v430_v6 = vadd.f32 %v1037_v2, %v1303_v36  ;;  %v421_v8 = vpop.f32.mrb[5].mxu0  ;;  %v549_v9 = vpop.f32.mrb[5].mxu1 }
  0xeb   :  { %v825_v5 = vsel %vm696_vm7, %v545_v57, %v761_v63  ;;  %v558_v7 = vadd.f32 %v1069_v3, %v1303_v36  ;;  %857 = vst [vmem:[%s1634_s4 + $0x18] sm:$0xff] %v793_v4  ;;  %v791_v10 = vsel %vm662_vm8, %v409_v60, %v727_v0  ;;  %v422_v12 = vadd.f32 %v1303_v36, %v421_v8  ;;  %v1038_v14 = vpop.f32.mrb[6].mxu0  ;;  %v1070_v15 = vpop.f32.mrb[6].mxu1 }
  0xec   :  { %889 = vst [vmem:[%s1634_s4 + $0x118] sm:$0xff] %v825_v5  ;;  %v823_v11 = vsel %vm694_vm9, %v537_v61, %v759_v1  ;;  %v550_v13 = vadd.f32 %v1303_v36, %v549_v9  ;;  %855 = vst [vmem:[%s1634_s4 + $0x8] sm:$0xff] %v791_v10  ;;  %vm667_vm10 = vcmp.ge.f32.partialorder %v430_v6, 0.0  ;;  %v732_v16 = vmul.f32 %v1308_v38, %v430_v6  ;;  %v424_v18 = vpop.f32.mrb[7].mxu0  ;;  %v552_v19 = vpop.f32.mrb[7].mxu1 }
  0xed   :  { %887 = vst [vmem:[%s1634_s4 + $0x108] sm:$0xff] %v823_v11  ;;  %vm699_vm11 = vcmp.ge.f32.partialorder %v558_v7, 0.0  ;;  %v764_v17 = vmul.f32 %v1308_v38, %v558_v7  ;;  %vm665_vm12 = vcmp.ge.f32.partialorder %v422_v12, 0.0  ;;  %v730_v20 = vmul.f32 %v1308_v38, %v422_v12 }
  0xee   :  { %vm697_vm13 = vcmp.ge.f32.partialorder %v550_v13, 0.0  ;;  %v762_v21 = vmul.f32 %v1308_v38, %v550_v13  ;;  %v796_v22 = vsel %vm667_vm10, %v430_v6, %v732_v16  ;;  %v433_v24 = vadd.f32 %v1038_v14, %v1303_v36 }
  0xef   :  { %v828_v23 = vsel %vm699_vm11, %v558_v7, %v764_v17  ;;  %v561_v25 = vadd.f32 %v1070_v15, %v1303_v36  ;;  %860 = vst [vmem:[%s1634_s4 + $0x30] sm:$0xff] %v796_v22  ;;  %v794_v26 = vsel %vm665_vm12, %v422_v12, %v730_v20  ;;  %v425_v28 = vadd.f32 %v1303_v36, %v424_v18 }
  0xf0   :  { %892 = vst [vmem:[%s1634_s4 + $0x130] sm:$0xff] %v828_v23  ;;  %v826_v27 = vsel %vm697_vm13, %v550_v13, %v762_v21  ;;  %v553_v29 = vadd.f32 %v1303_v36, %v552_v19  ;;  %858 = vst [vmem:[%s1634_s4 + $0x20] sm:$0xff] %v794_v26  ;;  %vm668_vm14 = vcmp.ge.f32.partialorder %v433_v24, 0.0  ;;  %v733_v30 = vmul.f32 %v1308_v38, %v433_v24 }
  0xf1   :  { %890 = vst [vmem:[%s1634_s4 + $0x120] sm:$0xff] %v826_v27  ;;  %vm700_vm15 = vcmp.ge.f32.partialorder %v561_v25, 0.0  ;;  %v765_v31 = vmul.f32 %v1308_v38, %v561_v25  ;;  %vm666_vm0 = vcmp.ge.f32.partialorder %v425_v28, 0.0  ;;  %v731_v32 = vmul.f32 %v1308_v38, %v425_v28  ;;  %v1041_v34 = vpop.f32.mrb[8].mxu0  ;;  %v1073_v35 = vpop.f32.mrb[8].mxu1 }
  0xf2   :  { %vm698_vm1 = vcmp.ge.f32.partialorder %v553_v29, 0.0  ;;  %v763_v33 = vmul.f32 %v1308_v38, %v553_v29  ;;  %v797_v37 = vsel %vm668_vm14, %v433_v24, %v733_v30  ;;  %v446_v40 = vadd.f32 %v1041_v34, %v1303_v36  ;;  %v437_v42 = vpop.f32.mrb[9].mxu0  ;;  %v565_v43 = vpop.f32.mrb[9].mxu1 }
  0xf3   :  { %v829_v39 = vsel %vm700_vm15, %v561_v25, %v765_v31  ;;  %v574_v41 = vadd.f32 %v1073_v35, %v1303_v36  ;;  %861 = vst [vmem:[%s1634_s4 + $0x38] sm:$0xff] %v797_v37  ;;  %v795_v44 = vsel %vm666_vm0, %v425_v28, %v731_v32  ;;  %v438_v46 = vadd.f32 %v1303_v36, %v437_v42  ;;  %v1042_v48 = vpop.f32.mrb[10].mxu0  ;;  %v1074_v49 = vpop.f32.mrb[10].mxu1 }
  0xf4   :  { %893 = vst [vmem:[%s1634_s4 + $0x138] sm:$0xff] %v829_v39  ;;  %v827_v45 = vsel %vm698_vm1, %v553_v29, %v763_v33  ;;  %v566_v47 = vadd.f32 %v1303_v36, %v565_v43  ;;  %859 = vst [vmem:[%s1634_s4 + $0x28] sm:$0xff] %v795_v44  ;;  %vm671_vm2 = vcmp.ge.f32.partialorder %v446_v40, 0.0  ;;  %v736_v50 = vmul.f32 %v1308_v38, %v446_v40  ;;  %v440_v52 = vpop.f32.mrb[11].mxu0  ;;  %v568_v53 = vpop.f32.mrb[11].mxu1 }
  0xf5   :  { %891 = vst [vmem:[%s1634_s4 + $0x128] sm:$0xff] %v827_v45  ;;  %vm703_vm3 = vcmp.ge.f32.partialorder %v574_v41, 0.0  ;;  %v768_v51 = vmul.f32 %v1308_v38, %v574_v41  ;;  %vm669_vm4 = vcmp.ge.f32.partialorder %v438_v46, 0.0  ;;  %v734_v54 = vmul.f32 %v1308_v38, %v438_v46 }
  0xf6   :  { %vm701_vm5 = vcmp.ge.f32.partialorder %v566_v47, 0.0  ;;  %v766_v55 = vmul.f32 %v1308_v38, %v566_v47  ;;  %v800_v56 = vsel %vm671_vm2, %v446_v40, %v736_v50  ;;  %v449_v58 = vadd.f32 %v1042_v48, %v1303_v36 }
  0xf7   :  { %v832_v57 = vsel %vm703_vm3, %v574_v41, %v768_v51  ;;  %v577_v59 = vadd.f32 %v1074_v49, %v1303_v36  ;;  %864 = vst [vmem:[%s1634_s4 + $0x50] sm:$0xff] %v800_v56  ;;  %v798_v60 = vsel %vm669_vm4, %v438_v46, %v734_v54  ;;  %v441_v62 = vadd.f32 %v1303_v36, %v440_v52 }
  0xf8   :  { %896 = vst [vmem:[%s1634_s4 + $0x150] sm:$0xff] %v832_v57  ;;  %v830_v61 = vsel %vm701_vm5, %v566_v47, %v766_v55  ;;  %v569_v63 = vadd.f32 %v1303_v36, %v568_v53  ;;  %862 = vst [vmem:[%s1634_s4 + $0x40] sm:$0xff] %v798_v60  ;;  %vm672_vm6 = vcmp.ge.f32.partialorder %v449_v58, 0.0  ;;  %v737_v0 = vmul.f32 %v1308_v38, %v449_v58 }
  0xf9   :  { %894 = vst [vmem:[%s1634_s4 + $0x140] sm:$0xff] %v830_v61  ;;  %vm704_vm7 = vcmp.ge.f32.partialorder %v577_v59, 0.0  ;;  %v769_v1 = vmul.f32 %v1308_v38, %v577_v59  ;;  %vm670_vm8 = vcmp.ge.f32.partialorder %v441_v62, 0.0  ;;  %v735_v2 = vmul.f32 %v1308_v38, %v441_v62  ;;  %v1045_v4 = vpop.f32.mrb[12].mxu0  ;;  %v1077_v5 = vpop.f32.mrb[12].mxu1 }
  0xfa   :  { %vm702_vm9 = vcmp.ge.f32.partialorder %v569_v63, 0.0  ;;  %v767_v3 = vmul.f32 %v1308_v38, %v569_v63  ;;  %v801_v6 = vsel %vm672_vm6, %v449_v58, %v737_v0  ;;  %v462_v8 = vadd.f32 %v1045_v4, %v1303_v36  ;;  %v453_v10 = vpop.f32.mrb[13].mxu0  ;;  %v581_v11 = vpop.f32.mrb[13].mxu1 }
  0xfb   :  { %v833_v7 = vsel %vm704_vm7, %v577_v59, %v769_v1  ;;  %v590_v9 = vadd.f32 %v1077_v5, %v1303_v36  ;;  %865 = vst [vmem:[%s1634_s4 + $0x58] sm:$0xff] %v801_v6  ;;  %v799_v12 = vsel %vm670_vm8, %v441_v62, %v735_v2  ;;  %v454_v14 = vadd.f32 %v1303_v36, %v453_v10  ;;  %v1046_v16 = vpop.f32.mrb[14].mxu0  ;;  %v1078_v17 = vpop.f32.mrb[14].mxu1 }
  0xfc   :  { %897 = vst [vmem:[%s1634_s4 + $0x158] sm:$0xff] %v833_v7  ;;  %v831_v13 = vsel %vm702_vm9, %v569_v63, %v767_v3  ;;  %v582_v15 = vadd.f32 %v1303_v36, %v581_v11  ;;  %863 = vst [vmem:[%s1634_s4 + $0x48] sm:$0xff] %v799_v12  ;;  %vm675_vm10 = vcmp.ge.f32.partialorder %v462_v8, 0.0  ;;  %v740_v18 = vmul.f32 %v1308_v38, %v462_v8  ;;  %v456_v20 = vpop.f32.mrb[15].mxu0  ;;  %v584_v21 = vpop.f32.mrb[15].mxu1 }
  0xfd   :  { %895 = vst [vmem:[%s1634_s4 + $0x148] sm:$0xff] %v831_v13  ;;  %vm707_vm11 = vcmp.ge.f32.partialorder %v590_v9, 0.0  ;;  %v772_v19 = vmul.f32 %v1308_v38, %v590_v9  ;;  %vm673_vm12 = vcmp.ge.f32.partialorder %v454_v14, 0.0  ;;  %v738_v22 = vmul.f32 %v1308_v38, %v454_v14 }
  0xfe   :  { %vm705_vm13 = vcmp.ge.f32.partialorder %v582_v15, 0.0  ;;  %v770_v23 = vmul.f32 %v1308_v38, %v582_v15  ;;  %v804_v24 = vsel %vm675_vm10, %v462_v8, %v740_v18  ;;  %v465_v26 = vadd.f32 %v1046_v16, %v1303_v36 }
  0xff   :  { %v836_v25 = vsel %vm707_vm11, %v590_v9, %v772_v19  ;;  %v593_v27 = vadd.f32 %v1078_v17, %v1303_v36  ;;  %868 = vst [vmem:[%s1634_s4 + $0x70] sm:$0xff] %v804_v24  ;;  %v802_v28 = vsel %vm673_vm12, %v454_v14, %v738_v22  ;;  %v457_v30 = vadd.f32 %v1303_v36, %v456_v20 }
 0x100   :  { %900 = vst [vmem:[%s1634_s4 + $0x170] sm:$0xff] %v836_v25  ;;  %v834_v29 = vsel %vm705_vm13, %v582_v15, %v770_v23  ;;  %v585_v31 = vadd.f32 %v1303_v36, %v584_v21  ;;  %866 = vst [vmem:[%s1634_s4 + $0x60] sm:$0xff] %v802_v28  ;;  %vm676_vm14 = vcmp.ge.f32.partialorder %v465_v26, 0.0  ;;  %v741_v32 = vmul.f32 %v1308_v38, %v465_v26 }
 0x101   :  { %898 = vst [vmem:[%s1634_s4 + $0x160] sm:$0xff] %v834_v29  ;;  %vm708_vm15 = vcmp.ge.f32.partialorder %v593_v27, 0.0  ;;  %v773_v33 = vmul.f32 %v1308_v38, %v593_v27  ;;  %vm674_vm0 = vcmp.ge.f32.partialorder %v457_v30, 0.0  ;;  %v739_v34 = vmul.f32 %v1308_v38, %v457_v30  ;;  %v1049_v37 = vpop.f32.mrb[16].mxu0  ;;  %v1081_v39 = vpop.f32.mrb[16].mxu1 }
 0x102   :  { %vm706_vm1 = vcmp.ge.f32.partialorder %v585_v31, 0.0  ;;  %v771_v35 = vmul.f32 %v1308_v38, %v585_v31  ;;  %v805_v40 = vsel %vm676_vm14, %v465_v26, %v741_v32  ;;  %v478_v42 = vadd.f32 %v1049_v37, %v1303_v36  ;;  %v469_v44 = vpop.f32.mrb[17].mxu0  ;;  %v597_v45 = vpop.f32.mrb[17].mxu1 }
 0x103   :  { %v837_v41 = vsel %vm708_vm15, %v593_v27, %v773_v33  ;;  %v606_v43 = vadd.f32 %v1081_v39, %v1303_v36  ;;  %869 = vst [vmem:[%s1634_s4 + $0x78] sm:$0xff] %v805_v40  ;;  %v803_v46 = vsel %vm674_vm0, %v457_v30, %v739_v34  ;;  %v470_v48 = vadd.f32 %v1303_v36, %v469_v44  ;;  %v1050_v50 = vpop.f32.mrb[18].mxu0  ;;  %v1082_v51 = vpop.f32.mrb[18].mxu1 }
 0x104   :  { %901 = vst [vmem:[%s1634_s4 + $0x178] sm:$0xff] %v837_v41  ;;  %v835_v47 = vsel %vm706_vm1, %v585_v31, %v771_v35  ;;  %v598_v49 = vadd.f32 %v1303_v36, %v597_v45  ;;  %867 = vst [vmem:[%s1634_s4 + $0x68] sm:$0xff] %v803_v46  ;;  %vm679_vm2 = vcmp.ge.f32.partialorder %v478_v42, 0.0  ;;  %v744_v52 = vmul.f32 %v1308_v38, %v478_v42  ;;  %v472_v54 = vpop.f32.mrb[19].mxu0  ;;  %v600_v55 = vpop.f32.mrb[19].mxu1 }
 0x105   :  { %899 = vst [vmem:[%s1634_s4 + $0x168] sm:$0xff] %v835_v47  ;;  %vm711_vm3 = vcmp.ge.f32.partialorder %v606_v43, 0.0  ;;  %v776_v53 = vmul.f32 %v1308_v38, %v606_v43  ;;  %vm677_vm4 = vcmp.ge.f32.partialorder %v470_v48, 0.0  ;;  %v742_v56 = vmul.f32 %v1308_v38, %v470_v48 }
 0x106   :  { %vm709_vm5 = vcmp.ge.f32.partialorder %v598_v49, 0.0  ;;  %v774_v57 = vmul.f32 %v1308_v38, %v598_v49  ;;  %v808_v58 = vsel %vm679_vm2, %v478_v42, %v744_v52  ;;  %v481_v60 = vadd.f32 %v1050_v50, %v1303_v36 }
 0x107   :  { %v840_v59 = vsel %vm711_vm3, %v606_v43, %v776_v53  ;;  %v609_v61 = vadd.f32 %v1082_v51, %v1303_v36  ;;  %872 = vst [vmem:[%s1634_s4 + $0x90] sm:$0xff] %v808_v58  ;;  %v806_v62 = vsel %vm677_vm4, %v470_v48, %v742_v56  ;;  %v473_v0 = vadd.f32 %v1303_v36, %v472_v54 }
 0x108   :  { %904 = vst [vmem:[%s1634_s4 + $0x190] sm:$0xff] %v840_v59  ;;  %v838_v63 = vsel %vm709_vm5, %v598_v49, %v774_v57  ;;  %v601_v1 = vadd.f32 %v1303_v36, %v600_v55  ;;  %870 = vst [vmem:[%s1634_s4 + $0x80] sm:$0xff] %v806_v62  ;;  %vm680_vm6 = vcmp.ge.f32.partialorder %v481_v60, 0.0  ;;  %v745_v2 = vmul.f32 %v1308_v38, %v481_v60 }
 0x109   :  { %902 = vst [vmem:[%s1634_s4 + $0x180] sm:$0xff] %v838_v63  ;;  %vm712_vm7 = vcmp.ge.f32.partialorder %v609_v61, 0.0  ;;  %v777_v3 = vmul.f32 %v1308_v38, %v609_v61  ;;  %vm678_vm8 = vcmp.ge.f32.partialorder %v473_v0, 0.0  ;;  %v743_v4 = vmul.f32 %v1308_v38, %v473_v0  ;;  %v1053_v6 = vpop.f32.mrb[20].mxu0  ;;  %v1085_v7 = vpop.f32.mrb[20].mxu1 }
 0x10a   :  { %vm710_vm9 = vcmp.ge.f32.partialorder %v601_v1, 0.0  ;;  %v775_v5 = vmul.f32 %v1308_v38, %v601_v1  ;;  %v809_v8 = vsel %vm680_vm6, %v481_v60, %v745_v2  ;;  %v494_v10 = vadd.f32 %v1053_v6, %v1303_v36  ;;  %v485_v12 = vpop.f32.mrb[21].mxu0  ;;  %v613_v13 = vpop.f32.mrb[21].mxu1 }
 0x10b   :  { %v841_v9 = vsel %vm712_vm7, %v609_v61, %v777_v3  ;;  %v622_v11 = vadd.f32 %v1085_v7, %v1303_v36  ;;  %873 = vst [vmem:[%s1634_s4 + $0x98] sm:$0xff] %v809_v8  ;;  %v807_v14 = vsel %vm678_vm8, %v473_v0, %v743_v4  ;;  %v486_v16 = vadd.f32 %v1303_v36, %v485_v12  ;;  %v1054_v18 = vpop.f32.mrb[22].mxu0  ;;  %v1086_v19 = vpop.f32.mrb[22].mxu1 }
 0x10c   :  { %905 = vst [vmem:[%s1634_s4 + $0x198] sm:$0xff] %v841_v9  ;;  %v839_v15 = vsel %vm710_vm9, %v601_v1, %v775_v5  ;;  %v614_v17 = vadd.f32 %v1303_v36, %v613_v13  ;;  %871 = vst [vmem:[%s1634_s4 + $0x88] sm:$0xff] %v807_v14  ;;  %vm683_vm10 = vcmp.ge.f32.partialorder %v494_v10, 0.0  ;;  %v748_v20 = vmul.f32 %v1308_v38, %v494_v10  ;;  %v488_v22 = vpop.f32.mrb[23].mxu0  ;;  %v616_v23 = vpop.f32.mrb[23].mxu1 }
 0x10d   :  { %903 = vst [vmem:[%s1634_s4 + $0x188] sm:$0xff] %v839_v15  ;;  %vm715_vm11 = vcmp.ge.f32.partialorder %v622_v11, 0.0  ;;  %v780_v21 = vmul.f32 %v1308_v38, %v622_v11  ;;  %vm681_vm12 = vcmp.ge.f32.partialorder %v486_v16, 0.0  ;;  %v746_v24 = vmul.f32 %v1308_v38, %v486_v16 }
 0x10e   :  { %vm713_vm13 = vcmp.ge.f32.partialorder %v614_v17, 0.0  ;;  %v778_v25 = vmul.f32 %v1308_v38, %v614_v17  ;;  %v812_v26 = vsel %vm683_vm10, %v494_v10, %v748_v20  ;;  %v497_v28 = vadd.f32 %v1054_v18, %v1303_v36 }
 0x10f   :  { %v844_v27 = vsel %vm715_vm11, %v622_v11, %v780_v21  ;;  %v625_v29 = vadd.f32 %v1086_v19, %v1303_v36  ;;  %876 = vst [vmem:[%s1634_s4 + $0xb0] sm:$0xff] %v812_v26  ;;  %v810_v30 = vsel %vm681_vm12, %v486_v16, %v746_v24  ;;  %v489_v32 = vadd.f32 %v1303_v36, %v488_v22 }
 0x110   :  { %908 = vst [vmem:[%s1634_s4 + $0x1b0] sm:$0xff] %v844_v27  ;;  %v842_v31 = vsel %vm713_vm13, %v614_v17, %v778_v25  ;;  %v617_v33 = vadd.f32 %v1303_v36, %v616_v23  ;;  %874 = vst [vmem:[%s1634_s4 + $0xa0] sm:$0xff] %v810_v30  ;;  %vm684_vm14 = vcmp.ge.f32.partialorder %v497_v28, 0.0  ;;  %v749_v34 = vmul.f32 %v1308_v38, %v497_v28 }
 0x111   :  { %906 = vst [vmem:[%s1634_s4 + $0x1a0] sm:$0xff] %v842_v31  ;;  %vm716_vm15 = vcmp.ge.f32.partialorder %v625_v29, 0.0  ;;  %v781_v35 = vmul.f32 %v1308_v38, %v625_v29  ;;  %vm682_vm0 = vcmp.ge.f32.partialorder %v489_v32, 0.0  ;;  %v747_v37 = vmul.f32 %v1308_v38, %v489_v32  ;;  %v1057_v40 = vpop.f32.mrb[24].mxu0  ;;  %v1089_v41 = vpop.f32.mrb[24].mxu1 }
 0x112   :  { %vm714_vm1 = vcmp.ge.f32.partialorder %v617_v33, 0.0  ;;  %v779_v39 = vmul.f32 %v1308_v38, %v617_v33  ;;  %v813_v42 = vsel %vm684_vm14, %v497_v28, %v749_v34  ;;  %v510_v44 = vadd.f32 %v1057_v40, %v1303_v36  ;;  %v501_v46 = vpop.f32.mrb[25].mxu0  ;;  %v629_v47 = vpop.f32.mrb[25].mxu1 }
 0x113   :  { %v845_v43 = vsel %vm716_vm15, %v625_v29, %v781_v35  ;;  %v638_v45 = vadd.f32 %v1089_v41, %v1303_v36  ;;  %877 = vst [vmem:[%s1634_s4 + $0xb8] sm:$0xff] %v813_v42  ;;  %v811_v48 = vsel %vm682_vm0, %v489_v32, %v747_v37  ;;  %v502_v50 = vadd.f32 %v1303_v36, %v501_v46  ;;  %v1058_v52 = vpop.f32.mrb[26].mxu0  ;;  %v1090_v53 = vpop.f32.mrb[26].mxu1 }
 0x114   :  { %909 = vst [vmem:[%s1634_s4 + $0x1b8] sm:$0xff] %v845_v43  ;;  %v843_v49 = vsel %vm714_vm1, %v617_v33, %v779_v39  ;;  %v630_v51 = vadd.f32 %v1303_v36, %v629_v47  ;;  %875 = vst [vmem:[%s1634_s4 + $0xa8] sm:$0xff] %v811_v48  ;;  %vm687_vm2 = vcmp.ge.f32.partialorder %v510_v44, 0.0  ;;  %v752_v54 = vmul.f32 %v1308_v38, %v510_v44  ;;  %v504_v56 = vpop.f32.mrb[27].mxu0  ;;  %v632_v57 = vpop.f32.mrb[27].mxu1 }
 0x115   :  { %907 = vst [vmem:[%s1634_s4 + $0x1a8] sm:$0xff] %v843_v49  ;;  %vm719_vm3 = vcmp.ge.f32.partialorder %v638_v45, 0.0  ;;  %v784_v55 = vmul.f32 %v1308_v38, %v638_v45  ;;  %vm685_vm4 = vcmp.ge.f32.partialorder %v502_v50, 0.0  ;;  %v750_v58 = vmul.f32 %v1308_v38, %v502_v50 }
 0x116   :  { %vm717_vm5 = vcmp.ge.f32.partialorder %v630_v51, 0.0  ;;  %v782_v59 = vmul.f32 %v1308_v38, %v630_v51  ;;  %v816_v60 = vsel %vm687_vm2, %v510_v44, %v752_v54  ;;  %v513_v62 = vadd.f32 %v1058_v52, %v1303_v36 }
 0x117   :  { %v848_v61 = vsel %vm719_vm3, %v638_v45, %v784_v55  ;;  %v641_v63 = vadd.f32 %v1090_v53, %v1303_v36  ;;  %880 = vst [vmem:[%s1634_s4 + $0xd0] sm:$0xff] %v816_v60  ;;  %v814_v0 = vsel %vm685_vm4, %v502_v50, %v750_v58  ;;  %v505_v2 = vadd.f32 %v1303_v36, %v504_v56 }
 0x118   :  { %912 = vst [vmem:[%s1634_s4 + $0x1d0] sm:$0xff] %v848_v61  ;;  %v846_v1 = vsel %vm717_vm5, %v630_v51, %v782_v59  ;;  %v633_v3 = vadd.f32 %v1303_v36, %v632_v57  ;;  %878 = vst [vmem:[%s1634_s4 + $0xc0] sm:$0xff] %v814_v0  ;;  %vm688_vm6 = vcmp.ge.f32.partialorder %v513_v62, 0.0  ;;  %v753_v4 = vmul.f32 %v1308_v38, %v513_v62 }
 0x119   :  { %910 = vst [vmem:[%s1634_s4 + $0x1c0] sm:$0xff] %v846_v1  ;;  %vm720_vm7 = vcmp.ge.f32.partialorder %v641_v63, 0.0  ;;  %v785_v5 = vmul.f32 %v1308_v38, %v641_v63  ;;  %vm686_vm8 = vcmp.ge.f32.partialorder %v505_v2, 0.0  ;;  %v751_v6 = vmul.f32 %v1308_v38, %v505_v2  ;;  %v1061_v8 = vpop.f32.mrb[28].mxu0  ;;  %v1093_v9 = vpop.f32.mrb[28].mxu1 }
 0x11a   :  { %vm718_vm9 = vcmp.ge.f32.partialorder %v633_v3, 0.0  ;;  %v783_v7 = vmul.f32 %v1308_v38, %v633_v3  ;;  %v817_v10 = vsel %vm688_vm6, %v513_v62, %v753_v4  ;;  %v526_v12 = vadd.f32 %v1061_v8, %v1303_v36  ;;  %v517_v14 = vpop.f32.mrb[29].mxu0  ;;  %v645_v15 = vpop.f32.mrb[29].mxu1 }
 0x11b   :  { %v849_v11 = vsel %vm720_vm7, %v641_v63, %v785_v5  ;;  %v654_v13 = vadd.f32 %v1093_v9, %v1303_v36  ;;  %881 = vst [vmem:[%s1634_s4 + $0xd8] sm:$0xff] %v817_v10  ;;  %v815_v16 = vsel %vm686_vm8, %v505_v2, %v751_v6  ;;  %v518_v18 = vadd.f32 %v1303_v36, %v517_v14  ;;  %v1062_v20 = vpop.f32.mrb[30].mxu0  ;;  %v1094_v21 = vpop.f32.mrb[30].mxu1 }
 0x11c   :  { %913 = vst [vmem:[%s1634_s4 + $0x1d8] sm:$0xff] %v849_v11  ;;  %v847_v17 = vsel %vm718_vm9, %v633_v3, %v783_v7  ;;  %v646_v19 = vadd.f32 %v1303_v36, %v645_v15  ;;  %879 = vst [vmem:[%s1634_s4 + $0xc8] sm:$0xff] %v815_v16  ;;  %vm691_vm10 = vcmp.ge.f32.partialorder %v526_v12, 0.0  ;;  %v756_v22 = vmul.f32 %v1308_v38, %v526_v12  ;;  %v520_v24 = vpop.f32.mrb[31].mxu0  ;;  %v648_v25 = vpop.f32.mrb[31].mxu1 }
 0x11d   :  { %911 = vst [vmem:[%s1634_s4 + $0x1c8] sm:$0xff] %v847_v17  ;;  %vm723_vm11 = vcmp.ge.f32.partialorder %v654_v13, 0.0  ;;  %v788_v23 = vmul.f32 %v1308_v38, %v654_v13  ;;  %vm689_vm12 = vcmp.ge.f32.partialorder %v518_v18, 0.0  ;;  %v754_v26 = vmul.f32 %v1308_v38, %v518_v18 }
 0x11e   :  { %vm721_vm13 = vcmp.ge.f32.partialorder %v646_v19, 0.0  ;;  %v786_v27 = vmul.f32 %v1308_v38, %v646_v19  ;;  %v820_v28 = vsel %vm691_vm10, %v526_v12, %v756_v22  ;;  %v529_v30 = vadd.f32 %v1062_v20, %v1303_v36 }
 0x11f   :  { %v852_v29 = vsel %vm723_vm11, %v654_v13, %v788_v23  ;;  %v657_v31 = vadd.f32 %v1094_v21, %v1303_v36  ;;  %884 = vst [vmem:[%s1634_s4 + $0xf0] sm:$0xff] %v820_v28  ;;  %v818_v32 = vsel %vm689_vm12, %v518_v18, %v754_v26  ;;  %v521_v34 = vadd.f32 %v1303_v36, %v520_v24 }
 0x120   :  { %916 = vst [vmem:[%s1634_s4 + $0x1f0] sm:$0xff] %v852_v29  ;;  %v850_v33 = vsel %vm721_vm13, %v646_v19, %v786_v27  ;;  %v649_v35 = vadd.f32 %v1303_v36, %v648_v25  ;;  %882 = vst [vmem:[%s1634_s4 + $0xe0] sm:$0xff] %v818_v32  ;;  %vm692_vm14 = vcmp.ge.f32.partialorder %v529_v30, 0.0  ;;  %v757_v37 = vmul.f32 %v1308_v38, %v529_v30 }
 0x121   :  { %914 = vst [vmem:[%s1634_s4 + $0x1e0] sm:$0xff] %v850_v33  ;;  %vm724_vm15 = vcmp.ge.f32.partialorder %v657_v31, 0.0  ;;  %v789_v39 = vmul.f32 %v1308_v38, %v657_v31  ;;  %vm690_vm0 = vcmp.ge.f32.partialorder %v521_v34, 0.0  ;;  %v755_v40 = vmul.f32 %v1308_v38, %v521_v34 }
 0x122   :  { %vm722_vm1 = vcmp.ge.f32.partialorder %v649_v35, 0.0  ;;  %v787_v36 = vmul.f32 %v1308_v38, %v649_v35  ;;  %v821_v41 = vsel %vm692_vm14, %v529_v30, %v757_v37 }
 0x123   :  { %v853_v42 = vsel %vm724_vm15, %v657_v31, %v789_v39  ;;  %885 = vst [vmem:[%s1634_s4 + $0xf8] sm:$0xff] %v821_v41  ;;  %v819_v43 = vsel %vm690_vm0, %v521_v34, %v755_v40 }
 0x124   :  { %917 = vst [vmem:[%s1634_s4 + $0x1f8] sm:$0xff] %v853_v42  ;;  %v851_v44 = vsel %vm722_vm1, %v649_v35, %v787_v36  ;;  %883 = vst [vmem:[%s1634_s4 + $0xe8] sm:$0xff] %v819_v43 }
 0x125   :  { %915 = vst [vmem:[%s1634_s4 + $0x1e8] sm:$0xff] %v851_v44 }

</bundles_post_ra>
